<compile_context>
chip_gen: v7x
topology: tpu7x:2x2x1
jax: 0.10.0
libtpu: 0.0.40
codegen_flags: <defaults>
</compile_context>

<pallas_src>
import jax
import jax.numpy as jnp
import numpy as np
from jax.experimental import pallas as pl
from jax.experimental.pallas import tpu as pltpu

IN_DIM = 300
HID_DIM = 50
OUT_DIM = 10
# Max rows per grid step.  At 1024: f32 x1 tile 1.2 MiB + int8 x2 tile 0.3 MiB,
# double-buffered ~3 MiB, plus ~0.4 MiB weights/outputs -> safe on all gens.
TILE_B_MAX = 1024

# Sublane alignment of the row (second-to-last) block dim, per element size.
_SUBLANE_ALIGN = {1: 32, 2: 16, 4: 8, 8: 8}


def _round_up(x, m):
    return ((x + m - 1) // m) * m


def _row_align(*arrs):
    return max(_SUBLANE_ALIGN.get(jnp.dtype(a.dtype).itemsize, 8) for a in arrs)


def _pick_tile(rows, align, cap):
    # Tiny batch: one full-extent block (full-array dims need no alignment).
    if rows <= align:
        return rows
    # Aim for >= 2 grid steps so v7x megacore shards the batch across both
    # TensorCores; cap keeps the tile in the efficient / VMEM-safe regime.
    return min(cap, _round_up(pl.cdiv(rows, 2), align))


def _branch(x, wa, ba, wb, bb):
    h = jnp.dot(x, wa, preferred_element_type=jnp.float32) + ba
    h = jnp.maximum(h, 0.0)
    y = jnp.dot(h, wb, preferred_element_type=jnp.float32) + bb
    # Row-wise, numerically stable log_softmax.  Identical to applying
    # log_softmax after the batch-axis concat, since rows are independent.
    m = jnp.max(y, axis=1, keepdims=True)
    s = y - m
    return s - jnp.log(jnp.sum(jnp.exp(s), axis=1, keepdims=True))


def _fused_kernel(
    x1_ref, x2_ref,
    w1a_ref, b1a_ref, w1b_ref, b1b_ref,
    w2a_ref, b2a_ref, w2b_ref, b2b_ref,
    o_ref,
):
    y1 = _branch(x1_ref[...].astype(jnp.float32),
                 w1a_ref[...], b1a_ref[...], w1b_ref[...], b1b_ref[...])
    y2 = _branch(x2_ref[...].astype(jnp.float32),
                 w2a_ref[...], b2a_ref[...], w2b_ref[...], b2b_ref[...])
    # Single lane-fused store: one (tb, 2*OUT_DIM) output DMA per grid step
    # instead of two tiny masked ones.
    o_ref[...] = jnp.concatenate([y1, y2], axis=1)


def _single_kernel(x_ref, wa_ref, ba_ref, wb_ref, bb_ref, o_ref):
    o_ref[...] = _branch(x_ref[...].astype(jnp.float32),
                         wa_ref[...], ba_ref[...], wb_ref[...], bb_ref[...])


def _resident(arr):
    # Full-array block + constant index_map: loaded once, stays resident in
    # VMEM across the whole batch grid (no per-step re-DMA of weights).
    return pl.BlockSpec(arr.shape, lambda i: (0, 0))


def _fused_call(x1, x2, params, tile_cap):
    (w1a, b1a, w1b, b1b, w2a, b2a, w2b, b2b) = params
    rows = x1.shape[0]
    tb = _pick_tile(rows, _row_align(x1, x2), tile_cap)
    x_spec = pl.BlockSpec((tb, IN_DIM), lambda i: (i, 0))
    out_spec = pl.BlockSpec((tb, 2 * OUT_DIM), lambda i: (i, 0))
    return pl.pallas_call(
        _fused_kernel,
        out_shape=jax.ShapeDtypeStruct((rows, 2 * OUT_DIM), jnp.float32),
        grid=(pl.cdiv(rows, tb),),
        in_specs=[x_spec, x_spec,
                  _resident(w1a), _resident(b1a), _resident(w1b), _resident(b1b),
                  _resident(w2a), _resident(b2a), _resident(w2b), _resident(b2b)],
        out_specs=out_spec,
        compiler_params=pltpu.CompilerParams(
            dimension_semantics=("parallel",)),
    )(x1, x2, w1a, b1a, w1b, b1b, w2a, b2a, w2b, b2b)


def _branch_call(x, wa, ba, wb, bb, tile_cap):
    rows = x.shape[0]
    tb = _pick_tile(rows, _row_align(x), tile_cap)
    return pl.pallas_call(
        _single_kernel,
        out_shape=jax.ShapeDtypeStruct((rows, OUT_DIM), jnp.float32),
        grid=(pl.cdiv(rows, tb),),
        in_specs=[pl.BlockSpec((tb, IN_DIM), lambda i: (i, 0)),
                  _resident(wa), _resident(ba), _resident(wb), _resident(bb)],
        out_specs=pl.BlockSpec((tb, OUT_DIM), lambda i: (i, 0)),
        compiler_params=pltpu.CompilerParams(
            dimension_semantics=("parallel",)),
    )(x, wa, ba, wb, bb)


def multiple_input_net(x1, x2, params, *, tile_b=TILE_B_MAX):
    (w1a, b1a, w1b, b1b, w2a, b2a, w2b, b2b) = params
    b1_rows, b2_rows = x1.shape[0], x2.shape[0]
    if b1_rows == b2_rows:
        # Equal batches: fused kernel, both input streams overlapped with
        # compute in one pipelined call, one lane-fused output slab.
        y = _fused_call(x1, x2, params, tile_b)
        return jnp.concatenate([y[:, :OUT_DIM], y[:, OUT_DIM:]], axis=0)
    # Unequal batches: run each branch at its own row count so neither branch
    # streams / computes on padding up to the other's length.
    y1 = _branch_call(x1, w1a, b1a, w1b, b1b, tile_b)
    y2 = _branch_call(x2, w2a, b2a, w2b, b2b, tile_b)
    return jnp.concatenate([y1, y2], axis=0)


def init_params(key):
    # Deterministic synthetic parameters (uniform like torch Linear default),
    # stored as (in, out) so the kernel computes x @ W + b directly.
    ks = jax.random.split(key, 8)

    def linear(kw, kb, fan_in, fan_out):
        bound = 1.0 / np.sqrt(fan_in)
        w = jax.random.uniform(kw, (fan_in, fan_out), jnp.float32, -bound, bound)
        b = jax.random.uniform(kb, (1, fan_out), jnp.float32, -bound, bound)
        return w, b

    w1a, b1a = linear(ks[0], ks[1], IN_DIM, HID_DIM)
    w1b, b1b = linear(ks[2], ks[3], HID_DIM, OUT_DIM)
    w2a, b2a = linear(ks[4], ks[5], IN_DIM, HID_DIM)
    w2b, b2b = linear(ks[6], ks[7], HID_DIM, OUT_DIM)
    return (w1a, b1a, w1b, b1b, w2a, b2a, w2b, b2b)


def reference(x1, x2, params):
    (w1a, b1a, w1b, b1b, w2a, b2a, w2b, b2b) = params
    y1 = jnp.maximum(x1 @ w1a + b1a, 0.0) @ w1b + b1b
    x2f = x2.astype(jnp.float32)
    y2 = jnp.maximum(x2f @ w2a + b2a, 0.0) @ w2b + b2b
    y = jnp.concatenate([y1, y2], axis=0)
    return jax.nn.log_softmax(y, axis=1)


if __name__ == "__main__":
    key = jax.random.PRNGKey(0)
    k_param, k_x1, k_x2, k_x3 = jax.random.split(key, 4)

    params = init_params(k_param)

    # Case 1: equal batches (fused path).  x2 is int8: "different dtypes"
    # contract + 4x less HBM traffic for the second input stream.
    B = 2
    x1 = jax.random.normal(k_x1, (B, IN_DIM), jnp.float32)
    x2 = jax.random.randint(k_x2, (B, IN_DIM), minval=-5, maxval=6,
                            dtype=jnp.int32).astype(jnp.int8)
    out = jax.block_until_ready(multiple_input_net(x1, x2, params))
    ref = reference(x1, x2, params)
    np.testing.assert_allclose(np.asarray(out), np.asarray(ref),
                               rtol=1e-5, atol=1e-5)

    # Case 2: unequal batches (per-branch path, no cross-branch padding).
    x1b = jax.random.normal(k_x3, (2, IN_DIM), jnp.float32)
    x2b = jax.random.randint(k_x2, (5, IN_DIM), minval=-5, maxval=6,
                             dtype=jnp.int32).astype(jnp.int8)
    out_b = jax.block_until_ready(multiple_input_net(x1b, x2b, params))
    ref_b = reference(x1b, x2b, params)
    np.testing.assert_allclose(np.asarray(out_b), np.asarray(ref_b),
                               rtol=1e-5, atol=1e-5)

    print("KERNEL_OK")
</pallas_src>

<mosaic_0001>
module attributes {stable_mosaic.version = 11 : i64} {
  func.func @_fused_kernel(%arg0: i32, %arg1: memref<2x300xf32, #tpu.memory_space<vmem>>, %arg2: memref<2x300xi8, #tpu.memory_space<vmem>>, %arg3: memref<300x50xf32, #tpu.memory_space<vmem>>, %arg4: memref<1x50xf32, #tpu.memory_space<vmem>>, %arg5: memref<50x10xf32, #tpu.memory_space<vmem>>, %arg6: memref<1x10xf32, #tpu.memory_space<vmem>>, %arg7: memref<300x50xf32, #tpu.memory_space<vmem>>, %arg8: memref<1x50xf32, #tpu.memory_space<vmem>>, %arg9: memref<50x10xf32, #tpu.memory_space<vmem>>, %arg10: memref<1x10xf32, #tpu.memory_space<vmem>>, %arg11: memref<2x20xf32, #tpu.memory_space<vmem>>) attributes {dimension_semantics = [#tpu.dimension_semantics<parallel>], iteration_bounds = array<i64: 1>, scalar_prefetch = 0 : i64, scratch_operands = 0 : i64, tpu.core_type = #tpu.core_type<tc>, window_params = [{transform_indices = @transform_0, window_bounds = array<i64: 2, 300>}, {transform_indices = @transform_1, window_bounds = array<i64: 2, 300>}, {pipeline_mode = #tpu.pipeline_mode<synchronous>, transform_indices = @transform_2, window_bounds = array<i64: 300, 50>}, {pipeline_mode = #tpu.pipeline_mode<synchronous>, transform_indices = @transform_3, window_bounds = array<i64: 1, 50>}, {pipeline_mode = #tpu.pipeline_mode<synchronous>, transform_indices = @transform_4, window_bounds = array<i64: 50, 10>}, {pipeline_mode = #tpu.pipeline_mode<synchronous>, transform_indices = @transform_5, window_bounds = array<i64: 1, 10>}, {pipeline_mode = #tpu.pipeline_mode<synchronous>, transform_indices = @transform_6, window_bounds = array<i64: 300, 50>}, {pipeline_mode = #tpu.pipeline_mode<synchronous>, transform_indices = @transform_7, window_bounds = array<i64: 1, 50>}, {pipeline_mode = #tpu.pipeline_mode<synchronous>, transform_indices = @transform_8, window_bounds = array<i64: 50, 10>}, {pipeline_mode = #tpu.pipeline_mode<synchronous>, transform_indices = @transform_9, window_bounds = array<i64: 1, 10>}, {transform_indices = @transform_10, window_bounds = array<i64: 2, 20>}]} {
    %c0 = arith.constant 0 : index
    %c0_0 = arith.constant 0 : index
    %0 = vector.load %arg1[%c0, %c0_0] : memref<2x300xf32, #tpu.memory_space<vmem>>, vector<2x300xf32>
    %c0_1 = arith.constant 0 : index
    %c0_2 = arith.constant 0 : index
    %1 = vector.load %arg3[%c0_1, %c0_2] : memref<300x50xf32, #tpu.memory_space<vmem>>, vector<300x50xf32>
    %c0_3 = arith.constant 0 : index
    %c0_4 = arith.constant 0 : index
    %2 = vector.load %arg4[%c0_3, %c0_4] : memref<1x50xf32, #tpu.memory_space<vmem>>, vector<1x50xf32>
    %c0_5 = arith.constant 0 : index
    %c0_6 = arith.constant 0 : index
    %3 = vector.load %arg5[%c0_5, %c0_6] : memref<50x10xf32, #tpu.memory_space<vmem>>, vector<50x10xf32>
    %c0_7 = arith.constant 0 : index
    %c0_8 = arith.constant 0 : index
    %4 = vector.load %arg6[%c0_7, %c0_8] : memref<1x10xf32, #tpu.memory_space<vmem>>, vector<1x10xf32>
    %cst = arith.constant dense<0.000000e+00> : vector<2x50xf32>
    %5 = tpu.matmul %0, %1, %cst {dimension_numbers = #tpu.dot_dimension_numbers<[1], [0], [0], [1], [0, 0, 1, 1], [], []>} : vector<2x300xf32>, vector<300x50xf32>, vector<2x50xf32> -> vector<2x50xf32>
    %6 = vector.broadcast %2 : vector<1x50xf32> to vector<2x50xf32>
    %7 = arith.addf %5, %6 : vector<2x50xf32>
    %cst_9 = arith.constant 0.000000e+00 : f32
    %8 = vector.broadcast %cst_9 : f32 to vector<2x50xf32>
    %9 = arith.maximumf %7, %8 : vector<2x50xf32>
    %cst_10 = arith.constant dense<0.000000e+00> : vector<2x10xf32>
    %10 = tpu.matmul %9, %3, %cst_10 {dimension_numbers = #tpu.dot_dimension_numbers<[1], [0], [0], [1], [0, 0, 1, 1], [], []>} : vector<2x50xf32>, vector<50x10xf32>, vector<2x10xf32> -> vector<2x10xf32>
    %11 = vector.broadcast %4 : vector<1x10xf32> to vector<2x10xf32>
    %12 = arith.addf %10, %11 : vector<2x10xf32>
    %cst_11 = arith.constant dense<0xFF800000> : vector<2xf32>
    %13 = vector.multi_reduction <maximumf>, %12, %cst_11 [1] : vector<2x10xf32> to vector<2xf32>
    %14 = vector.shape_cast %13 : vector<2xf32> to vector<2x1xf32>
    %15 = vector.broadcast %14 : vector<2x1xf32> to vector<2x10xf32>
    %16 = arith.subf %12, %15 : vector<2x10xf32>
    %17 = math.exp %16 : vector<2x10xf32>
    %cst_12 = arith.constant dense<0.000000e+00> : vector<2xf32>
    %18 = vector.multi_reduction <add>, %17, %cst_12 [1] : vector<2x10xf32> to vector<2xf32>
    %19 = vector.shape_cast %18 : vector<2xf32> to vector<2x1xf32>
    %20 = math.log %19 : vector<2x1xf32>
    %21 = vector.broadcast %20 : vector<2x1xf32> to vector<2x10xf32>
    %22 = arith.subf %16, %21 : vector<2x10xf32>
    %c0_13 = arith.constant 0 : index
    %c0_14 = arith.constant 0 : index
    %23 = vector.load %arg2[%c0_13, %c0_14] : memref<2x300xi8, #tpu.memory_space<vmem>>, vector<2x300xi8>
    %24 = arith.sitofp %23 : vector<2x300xi8> to vector<2x300xf32>
    %c0_15 = arith.constant 0 : index
    %c0_16 = arith.constant 0 : index
    %25 = vector.load %arg7[%c0_15, %c0_16] : memref<300x50xf32, #tpu.memory_space<vmem>>, vector<300x50xf32>
    %c0_17 = arith.constant 0 : index
    %c0_18 = arith.constant 0 : index
    %26 = vector.load %arg8[%c0_17, %c0_18] : memref<1x50xf32, #tpu.memory_space<vmem>>, vector<1x50xf32>
    %c0_19 = arith.constant 0 : index
    %c0_20 = arith.constant 0 : index
    %27 = vector.load %arg9[%c0_19, %c0_20] : memref<50x10xf32, #tpu.memory_space<vmem>>, vector<50x10xf32>
    %c0_21 = arith.constant 0 : index
    %c0_22 = arith.constant 0 : index
    %28 = vector.load %arg10[%c0_21, %c0_22] : memref<1x10xf32, #tpu.memory_space<vmem>>, vector<1x10xf32>
    %cst_23 = arith.constant dense<0.000000e+00> : vector<2x50xf32>
    %29 = tpu.matmul %24, %25, %cst_23 {dimension_numbers = #tpu.dot_dimension_numbers<[1], [0], [0], [1], [0, 0, 1, 1], [], []>} : vector<2x300xf32>, vector<300x50xf32>, vector<2x50xf32> -> vector<2x50xf32>
    %30 = vector.broadcast %26 : vector<1x50xf32> to vector<2x50xf32>
    %31 = arith.addf %29, %30 : vector<2x50xf32>
    %cst_24 = arith.constant 0.000000e+00 : f32
    %32 = vector.broadcast %cst_24 : f32 to vector<2x50xf32>
    %33 = arith.maximumf %31, %32 : vector<2x50xf32>
    %cst_25 = arith.constant dense<0.000000e+00> : vector<2x10xf32>
    %34 = tpu.matmul %33, %27, %cst_25 {dimension_numbers = #tpu.dot_dimension_numbers<[1], [0], [0], [1], [0, 0, 1, 1], [], []>} : vector<2x50xf32>, vector<50x10xf32>, vector<2x10xf32> -> vector<2x10xf32>
    %35 = vector.broadcast %28 : vector<1x10xf32> to vector<2x10xf32>
    %36 = arith.addf %34, %35 : vector<2x10xf32>
    %cst_26 = arith.constant dense<0xFF800000> : vector<2xf32>
    %37 = vector.multi_reduction <maximumf>, %36, %cst_26 [1] : vector<2x10xf32> to vector<2xf32>
    %38 = vector.shape_cast %37 : vector<2xf32> to vector<2x1xf32>
    %39 = vector.broadcast %38 : vector<2x1xf32> to vector<2x10xf32>
    %40 = arith.subf %36, %39 : vector<2x10xf32>
    %41 = math.exp %40 : vector<2x10xf32>
    %cst_27 = arith.constant dense<0.000000e+00> : vector<2xf32>
    %42 = vector.multi_reduction <add>, %41, %cst_27 [1] : vector<2x10xf32> to vector<2xf32>
    %43 = vector.shape_cast %42 : vector<2xf32> to vector<2x1xf32>
    %44 = math.log %43 : vector<2x1xf32>
    %45 = vector.broadcast %44 : vector<2x1xf32> to vector<2x10xf32>
    %46 = arith.subf %40, %45 : vector<2x10xf32>
    %47 = tpu.concatenate %22, %46 in 1 : vector<2x10xf32>, vector<2x10xf32> -> vector<2x20xf32>
    %c0_28 = arith.constant 0 : index
    %c0_29 = arith.constant 0 : index
    %48 = vector.load %arg11[%c0_28, %c0_29] : memref<2x20xf32, #tpu.memory_space<vmem>>, vector<2x20xf32>
    tpu.vector_store %arg11[%c0_28, %c0_29], %47 {strides = array<i32>} : memref<2x20xf32, #tpu.memory_space<vmem>>, vector<2x20xf32>,
    return
  }
  func.func @transform_0(%arg0: i32) -> (i32, i32) {
    %c0_i32 = arith.constant 0 : i32
    %c0_i32_0 = arith.constant 0 : i32
    return %arg0, %c0_i32 : i32, i32
  }
  func.func @transform_1(%arg0: i32) -> (i32, i32) {
    %c0_i32 = arith.constant 0 : i32
    %c0_i32_0 = arith.constant 0 : i32
    return %arg0, %c0_i32 : i32, i32
  }
  func.func @transform_2(%arg0: i32) -> (i32, i32) {
    %c0_i32 = arith.constant 0 : i32
    %c0_i32_0 = arith.constant 0 : i32
    %c0_i32_1 = arith.constant 0 : i32
    return %c0_i32, %c0_i32_0 : i32, i32
  }
  func.func @transform_3(%arg0: i32) -> (i32, i32) {
    %c0_i32 = arith.constant 0 : i32
    %c0_i32_0 = arith.constant 0 : i32
    %c0_i32_1 = arith.constant 0 : i32
    return %c0_i32, %c0_i32_0 : i32, i32
  }
  func.func @transform_4(%arg0: i32) -> (i32, i32) {
    %c0_i32 = arith.constant 0 : i32
    %c0_i32_0 = arith.constant 0 : i32
    %c0_i32_1 = arith.constant 0 : i32
    return %c0_i32, %c0_i32_0 : i32, i32
  }
  func.func @transform_5(%arg0: i32) -> (i32, i32) {
    %c0_i32 = arith.constant 0 : i32
    %c0_i32_0 = arith.constant 0 : i32
    %c0_i32_1 = arith.constant 0 : i32
    return %c0_i32, %c0_i32_0 : i32, i32
  }
  func.func @transform_6(%arg0: i32) -> (i32, i32) {
    %c0_i32 = arith.constant 0 : i32
    %c0_i32_0 = arith.constant 0 : i32
    %c0_i32_1 = arith.constant 0 : i32
    return %c0_i32, %c0_i32_0 : i32, i32
  }
  func.func @transform_7(%arg0: i32) -> (i32, i32) {
    %c0_i32 = arith.constant 0 : i32
    %c0_i32_0 = arith.constant 0 : i32
    %c0_i32_1 = arith.constant 0 : i32
    return %c0_i32, %c0_i32_0 : i32, i32
  }
  func.func @transform_8(%arg0: i32) -> (i32, i32) {
    %c0_i32 = arith.constant 0 : i32
    %c0_i32_0 = arith.constant 0 : i32
    %c0_i32_1 = arith.constant 0 : i32
    return %c0_i32, %c0_i32_0 : i32, i32
  }
  func.func @transform_9(%arg0: i32) -> (i32, i32) {
    %c0_i32 = arith.constant 0 : i32
    %c0_i32_0 = arith.constant 0 : i32
    %c0_i32_1 = arith.constant 0 : i32
    return %c0_i32, %c0_i32_0 : i32, i32
  }
  func.func @transform_10(%arg0: i32) -> (i32, i32) {
    %c0_i32 = arith.constant 0 : i32
    %c0_i32_0 = arith.constant 0 : i32
    return %arg0, %c0_i32 : i32, i32
  }
}

</mosaic_0001>

<bundles_post_ra>
// kernel: tpu_custom_call.1
= control target key start
LH: loop header
LB: loop body
LE: loop exit
PB: predicated region body
PF: predicated region fallthrough
CT: control target
= control target key end

     0   :  { %v996_v7 = vmov 0.0|0.0   ;;  %v997_v8 = vmov 1983009808   ;;  %v95_v10 = vlaneseq  ;;  %vm998_vm0 = vmmov 0   ;;  %s1403_s0 = inlined_call_operand.vmem [shape: f32[2,300], index: 0, kind: input, shape index: {}]   ;;  %s1404_s1 = inlined_call_operand.vmem [shape: s8[2,300], index: 1, kind: input, shape index: {}]   ;;  %s1405_s2 = inlined_call_operand.vmem [shape: f32[300,50], index: 2, kind: input, shape index: {}]   ;;  %s1406_s3 = inlined_call_operand.vmem [shape: f32[1,50], index: 3, kind: input, shape index: {}]   ;;  %s1407_s4 = inlined_call_operand.vmem [shape: f32[50,10], index: 4, kind: input, shape index: {}]   ;;  %s1408_s5 = inlined_call_operand.vmem [shape: f32[1,10], index: 5, kind: input, shape index: {}]   ;;  %s1409_s6 = inlined_call_operand.vmem [shape: f32[300,50], index: 6, kind: input, shape index: {}]   ;;  %s1410_s7 = inlined_call_operand.vmem [shape: f32[1,50], index: 7, kind: input, shape index: {}]   ;;  %s1411_s8 = inlined_call_operand.vmem [shape: f32[50,10], index: 8, kind: input, shape index: {}]   ;;  %s1412_s9 = inlined_call_operand.vmem [shape: f32[1,10], index: 9, kind: input, shape index: {}]   ;;  %s1413_s10 = inlined_call_operand.hbm [shape: f32[2,20], index: 10, kind: output, shape index: {}]  }
   0x1   :  { %v53_v0 = vld [vmem:[%s1405_s2 + $0x80] sm:$0xff]  ;;  %v54_v1 = vld [vmem:[%s1405_s2 + $0x88] sm:$0xff]  ;;  %v55_v5 = vld [vmem:[%s1405_s2 + $0x90] sm:$0xff]  ;;  %886 = vmatprep.subr.bf16.mxu1 %v996_v7  ;;  %v93_v9 = vunpack.c.l.s4 %v997_v8  ;;  %v999_v18 = vmov 0.0   ;;  %vm112_vm1 = vcmask 1043456  }
   0x2   :  { %v37_v2 = vld [vmem:[%s1405_s2] sm:$0xff]  ;;  %v854_v3 = vpack.c.bf16 %v54_v1, %v53_v0  ;;  %v38_v4 = vld [vmem:[%s1405_s2 + $0x8] sm:$0xff]  ;;  %v56_v6 = vld [vmem:[%s1405_s2 + $0x98] sm:$0xff]  ;;  %802 = vmatprep.mubr.msk.f32.mxu1 %vm998_vm0, %v999_v18  ;;  %v96_v23 = vshrl.u32 %v95_v10, 7 }
   0x3   :  { %v856_v11 = vpack.c.bf16 %v38_v4, %v37_v2  ;;  %v858_v12 = vpack.c.bf16 %v56_v6, %v55_v5  ;;  %v39_v13 = vld [vmem:[%s1405_s2 + $0x10] sm:$0xff]  ;;  %v40_v14 = vld [vmem:[%s1405_s2 + $0x18] sm:$0xff]  ;;  %v57_v15 = vld [vmem:[%s1405_s2 + $0xa0] sm:$0xff]  ;;  %v94_v22 = vunpack.c.0.s8 %v93_v9 }
   0x4   :  { %855 = vmatprep.subr.bf16.mxu0 %v854_v3  ;;  %v58_v16 = vld [vmem:[%s1405_s2 + $0xa8] sm:$0xff]  ;;  %v860_v17 = vpack.c.bf16 %v40_v14, %v39_v13  ;;  %v41_v20 = vld [vmem:[%s1405_s2 + $0x20] sm:$0xff]  ;;  %v59_v24 = vld [vmem:[%s1405_s2 + $0xb0] sm:$0xff] }
   0x5   :  { %857 = vmatpush3.bf16.msra.mxu0 %v856_v11  ;;  %v862_v19 = vpack.c.bf16 %v58_v16, %v57_v15  ;;  %v42_v21 = vld [vmem:[%s1405_s2 + $0x28] sm:$0xff]  ;;  %v60_v25 = vld [vmem:[%s1405_s2 + $0xb8] sm:$0xff]  ;;  %v43_v27 = vld [vmem:[%s1405_s2 + $0x30] sm:$0xff]  ;;  %v97_v32 = vsub.s32 %v94_v22, %v96_v23 }
   0x6   :  { %859 = vmatprep.subr.bf16.mxu0 %v858_v12  ;;  %v864_v26 = vpack.c.bf16 %v42_v21, %v41_v20  ;;  %v866_v28 = vpack.c.bf16 %v60_v25, %v59_v24  ;;  %v44_v29 = vld [vmem:[%s1405_s2 + $0x38] sm:$0xff]  ;;  %v69_v30 = vld [vmem:[%s1405_s2 + $0x100] sm:$0xff]  ;;  %v70_v31 = vld [vmem:[%s1405_s2 + $0x108] sm:$0xff] }
   0x7   :  { %v61_v33 = vld [vmem:[%s1405_s2 + $0xc0] sm:$0xff]  ;;  %v62_v34 = vld [vmem:[%s1405_s2 + $0xc8] sm:$0xff]  ;;  %v887_v35 = vpack.c.bf16 %v70_v31, %v69_v30  ;;  %v71_v36 = vld [vmem:[%s1405_s2 + $0x110] sm:$0xff]  ;;  %v868_v38 = vpack.c.bf16 %v44_v29, %v43_v27 }
   0x8   :  { %v72_v37 = vld [vmem:[%s1405_s2 + $0x118] sm:$0xff]  ;;  %v45_v39 = vld [vmem:[%s1405_s2 + $0x40] sm:$0xff]  ;;  %v870_v42 = vpack.c.bf16 %v62_v34, %v61_v33  ;;  %v46_v43 = vld [vmem:[%s1405_s2 + $0x48] sm:$0xff] }
   0x9   :  { %861 = vmatpush3.bf16.msra.mxu0 %v860_v17  ;;  %888 = vmatpush3.bf16.msra.mxu1 %v887_v35  ;;  %v890_v40 = vpack.c.bf16 %v72_v37, %v71_v36  ;;  %v36_v41 = vld [vmem:[%s1403_s0] sm:$0x3f]  ;;  %v74_v46 = vld [vmem:[%s1405_s2 + $0x128] sm:$0xf]  ;;  %v63_v47 = vld [vmem:[%s1405_s2 + $0xd0] sm:$0xff] }
   0xa   :  { %863 = vmatprep.subr.bf16.mxu0 %v862_v19  ;;  %889 = vmatprep.subr.bf16.mxu1 %v996_v7  ;;  %v98_v44 = vrot.slane %v36_v41, %v97_v32  ;;  %v73_v45 = vld [vmem:[%s1405_s2 + $0x120] sm:$0xff]  ;;  %v64_v48 = vld [vmem:[%s1405_s2 + $0xd8] sm:$0xff] }
   0xd   :  { %865 = vmatpush3.bf16.msra.mxu0 %v864_v26 }
   0xe   :  { %867 = vmatprep.subr.bf16.mxu0 %v866_v28 }
   0xf   :  { %15 = vsyncpa [#allocation3], 0  ;;  %v91_v49 = vcombine.high %v36_v41, %v36_v41  ;;  %v106_v50 = vcombine.high %v98_v44, %v98_v44  ;;  %v872_v51 = vpack.c.bf16 %v46_v43, %v45_v39  ;;  %v47_v52 = vld [vmem:[%s1405_s2 + $0x50] sm:$0xff]  ;;  %v48_v53 = vld [vmem:[%s1405_s2 + $0x58] sm:$0xff]  ;;  %891 = vmatpush3.bf16.msra.mxu1 %v890_v40  ;;  %v893_v54 = vpack.c.bf16 %v74_v46, %v73_v45 }
  0x10   :  { %v874_v55 = vpack.c.bf16 %v64_v48, %v63_v47  ;;  %vm1000_vm2 = vmmov 1   ;;  %v76_v57 = vld [vmem:[%s1407_s4] sm:$0xff]  ;;  %v77_v58 = vld [vmem:[%s1407_s4 + $0x8] sm:$0xff]  ;;  %892 = vmatprep.subr.bf16.mxu1 %v996_v7  ;;  %v876_v62 = vpack.c.bf16 %v48_v53, %v47_v52  ;;  %vm109_vm4 = vcmask 359424   ;;  %v67_v3 = vld [vmem:[%s1405_s2 + $0xf0] sm:$0xff] }
  0x11   :  { %869 = vmatpush3.bf16.msra.mxu0 %v868_v38  ;;  %180 = vmatprep.mubr.f32.mxu0 %v106_v50  ;;  %vm1155_vm3 = vmpackc.low %vm112_vm1, %vm1000_vm2  ;;  %v65_v59 = vld [vmem:[%s1405_s2 + $0xe0] sm:$0xff]  ;;  %v66_v60 = vld [vmem:[%s1405_s2 + $0xe8] sm:$0xff]  ;;  %v105_v61 = vrot.slane %v91_v49, %v97_v32  ;;  %v897_v63 = vpack.c.bf16 %v77_v58, %v76_v57  ;;  %vm267_vm5 = vcmask 1041408   ;;  %vm263_vm6 = vcmask 408576  }
  0x12   :  { %871 = vmatprep.subr.bf16.mxu0 %v870_v42  ;;  %v878_v0 = vpack.c.bf16 %v66_v60, %v65_v59  ;;  %v49_v1 = vld [vmem:[%s1405_s2 + $0x60] sm:$0xff]  ;;  %v50_v2 = vld [vmem:[%s1405_s2 + $0x68] sm:$0xff]  ;;  %v68_v4 = vld [vmem:[%s1405_s2 + $0xf8] sm:$0xff]  ;;  %vm341_vm7 = vcmask 74752   ;;  %vm660_vm8 = vcmask 80896   ;;  %vm662_vm9 = vcmask 156672  }
  0x13   :  { %895 = vmatpush3.bf16.msk.msra.mxu1 %vm1155_vm3, %v893_v54  ;;  %v880_v5 = vpack.c.bf16 %v50_v2, %v49_v1  ;;  %v882_v6 = vpack.c.bf16 %v68_v4, %v67_v3  ;;  %v51_v8 = vld [vmem:[%s1405_s2 + $0x70] sm:$0xff]  ;;  %v52_v9 = vld [vmem:[%s1405_s2 + $0x78] sm:$0xff]  ;;  %v80_v14 = vld [vmem:[%s1407_s4 + $0x20] sm:$0xff] }
  0x14   :  { %896 = vmatprep.subr.bf16.mxu1 %v996_v7  ;;  %v884_v10 = vpack.c.bf16 %v52_v9, %v51_v8  ;;  %v78_v11 = vld [vmem:[%s1407_s4 + $0x10] sm:$0xff]  ;;  %v79_v12 = vld [vmem:[%s1407_s4 + $0x18] sm:$0xff]  ;;  %v81_v15 = vld [vmem:[%s1407_s4 + $0x28] sm:$0xff] }
  0x15   :  { %873 = vmatpush3.bf16.msra.mxu0 %v872_v51  ;;  %v900_v13 = vpack.c.bf16 %v79_v12, %v78_v11  ;;  %v903_v16 = vpack.c.bf16 %v81_v15, %v80_v14  ;;  %v375_v17 = vld [vmem:[%s1409_s6 + $0x80] sm:$0xff]  ;;  %v376_v19 = vld [vmem:[%s1409_s6 + $0x88] sm:$0xff]  ;;  %v82_v20 = vld [vmem:[%s1407_s4 + $0x30] sm:$0x3] }
  0x16   :  { %875 = vmatprep.subr.bf16.mxu0 %v874_v55  ;;  %803 = vmatmul.mubr.msk.f32.vlgmr.msra.gmra.mrb[0].mxu1 %vm109_vm4, %v105_v61  ;;  %v905_v21 = vpack.c.bf16 %v376_v19, %v375_v17  ;;  %v391_v22 = vld [vmem:[%s1409_s6 + $0x100] sm:$0xff]  ;;  %v392_v23 = vld [vmem:[%s1409_s6 + $0x108] sm:$0xff]  ;;  %v393_v25 = vld [vmem:[%s1409_s6 + $0x110] sm:$0xff] }
  0x17   :  { %898 = vmatpush3.bf16.msra.mxu1 %v897_v63  ;;  %819 = vmatprep.mubr.msk.f32.mxu1 %vm998_vm0, %v999_v18  ;;  %v938_v24 = vpack.c.bf16 %v392_v23, %v391_v22  ;;  %v394_v26 = vld [vmem:[%s1409_s6 + $0x118] sm:$0xff]  ;;  %v354_v28 = vld [vmem:[%s1404_s1] sm:$0x7]  ;;  %v396_v31 = vld [vmem:[%s1409_s6 + $0x128] sm:$0xf] }
  0x18   :  { %899 = vmatprep.subr.bf16.mxu1 %v996_v7  ;;  %v941_v27 = vpack.c.bf16 %v394_v26, %v393_v25  ;;  %v356_v29 = vunpack.c.1.s8 %v354_v28  ;;  %v395_v30 = vld [vmem:[%s1409_s6 + $0x120] sm:$0xff]  ;;  %v355_v36 = vunpack.c.0.s8 %v354_v28  ;;  %v377_v45 = vld [vmem:[%s1409_s6 + $0x90] sm:$0xff]  ;;  %v378_v46 = vld [vmem:[%s1409_s6 + $0x98] sm:$0xff] }
  0x19   :  { %877 = vmatpush3.bf16.msra.mxu0 %v876_v62  ;;  %v944_v32 = vpack.c.bf16 %v396_v31, %v395_v30  ;;  %v678_v39 = vld [vmem:[%s1406_s3] ss:$0 sm:$0xff]  ;;  %v909_v51 = vpack.c.bf16 %v378_v46, %v377_v45  ;;  %v361_v52 = vld [vmem:[%s1409_s6 + $0x10] sm:$0xff]  ;;  %v362_v53 = vld [vmem:[%s1409_s6 + $0x18] sm:$0xff] }
  0x1a   :  { %879 = vmatprep.subr.bf16.mxu0 %v878_v0  ;;  %v358_v33 = vcvt.s32.f32 %v356_v29  ;;  %v1256_v41 = vcvt.s32.f32 %v355_v36  ;;  %v359_v43 = vld [vmem:[%s1409_s6] sm:$0xff]  ;;  %v380_v55 = vld [vmem:[%s1409_s6 + $0xa8] sm:$0xff]  ;;  %v911_v56 = vpack.c.bf16 %v362_v53, %v361_v52  ;;  %v381_v60 = vld [vmem:[%s1409_s6 + $0xb0] sm:$0xff] }
  0x1b   :  { %901 = vmatpush3.bf16.msra.mxu1 %v900_v13  ;;  %v379_v54 = vld [vmem:[%s1409_s6 + $0xa0] sm:$0xff]  ;;  %v364_v59 = vld [vmem:[%s1409_s6 + $0x28] sm:$0xff]  ;;  %v382_v61 = vld [vmem:[%s1409_s6 + $0xb8] sm:$0xff] }
  0x1c   :  { %902 = vmatprep.subr.bf16.mxu1 %v996_v7  ;;  %v414_v49 = vcombine.high %v1256_v41, %v1256_v41  ;;  %v913_v57 = vpack.c.bf16 %v380_v55, %v379_v54  ;;  %v363_v58 = vld [vmem:[%s1409_s6 + $0x20] sm:$0xff]  ;;  %v917_v63 = vpack.c.bf16 %v382_v61, %v381_v60  ;;  %v365_v0 = vld [vmem:[%s1409_s6 + $0x30] sm:$0xff]  ;;  %v366_v1 = vld [vmem:[%s1409_s6 + $0x38] sm:$0xff] }
  0x1d   :  { %881 = vmatpush3.bf16.msra.mxu0 %v880_v5  ;;  %v915_v62 = vpack.c.bf16 %v364_v59, %v363_v58  ;;  %v383_v2 = vld [vmem:[%s1409_s6 + $0xc0] sm:$0xff]  ;;  %v384_v3 = vld [vmem:[%s1409_s6 + $0xc8] sm:$0xff]  ;;  %v919_v4 = vpack.c.bf16 %v366_v1, %v365_v0  ;;  %v385_v9 = vld [vmem:[%s1409_s6 + $0xd0] sm:$0xff] }
  0x1e   :  { %883 = vmatprep.subr.bf16.mxu0 %v882_v6  ;;  %v921_v5 = vpack.c.bf16 %v384_v3, %v383_v2  ;;  %v367_v6 = vld [vmem:[%s1409_s6 + $0x40] sm:$0xff]  ;;  %v368_v8 = vld [vmem:[%s1409_s6 + $0x48] sm:$0xff]  ;;  %v369_v13 = vld [vmem:[%s1409_s6 + $0x50] sm:$0xff] }
  0x1f   :  { %904 = vmatpush3.bf16.msra.mxu1 %v903_v16  ;;  %v923_v11 = vpack.c.bf16 %v368_v8, %v367_v6  ;;  %v370_v14 = vld [vmem:[%s1409_s6 + $0x58] sm:$0xff]  ;;  %v387_v15 = vld [vmem:[%s1409_s6 + $0xe0] sm:$0xff]  ;;  %v388_v16 = vld [vmem:[%s1409_s6 + $0xe8] sm:$0xff] }
  0x20   :  { %817 = vmatprep.subr.mxu1 %v999_v18  ;;  %v927_v17 = vpack.c.bf16 %v370_v14, %v369_v13  ;;  %v929_v19 = vpack.c.bf16 %v388_v16, %v387_v15  ;;  %v389_v22 = vld [vmem:[%s1409_s6 + $0xf0] sm:$0xff]  ;;  %v390_v23 = vld [vmem:[%s1409_s6 + $0xf8] sm:$0xff]  ;;  %v398_v29 = vld [vmem:[%s1411_s8] sm:$0xff] }
  0x21   :  { %885 = vmatpush3.bf16.msra.mxu0 %v884_v10  ;;  %v386_v10 = vld [vmem:[%s1409_s6 + $0xd8] sm:$0xff]  ;;  %v933_v25 = vpack.c.bf16 %v390_v23, %v389_v22  ;;  %v373_v26 = vld [vmem:[%s1409_s6 + $0x70] sm:$0xff]  ;;  %v399_v30 = vld [vmem:[%s1411_s8 + $0x8] sm:$0xff] }
  0x22   :  { %937 = vmatprep.subr.bf16.mxu0 %v996_v7  ;;  %v925_v12 = vpack.c.bf16 %v386_v10, %v385_v9  ;;  %v948_v31 = vpack.c.bf16 %v399_v30, %v398_v29  ;;  %v403_v36 = vld [vmem:[%s1411_s8 + $0x28] sm:$0xff] }
  0x23   :  { %818 = vmatpush3.msk.msra.mxu1 %vm267_vm5, %v82_v20  ;;  %v371_v20 = vld [vmem:[%s1409_s6 + $0x60] sm:$0xff] }
  0x24   :  { %181 = vmatmul.mubr.f32.vlgmr.msra.gmra.mrb[0].mxu0 %v98_v44  ;;  %906 = vmatprep.subr.bf16.mxu1 %v905_v21  ;;  %v360_v44 = vld [vmem:[%s1409_s6 + $0x8] sm:$0xff] }
  0x25   :  { %834 = vmatprep.mubr.msk.f32.mxu0 %vm998_vm0, %v999_v18  ;;  %939 = vmatpush3.bf16.msra.mxu0 %v938_v24  ;;  %v907_v48 = vpack.c.bf16 %v360_v44, %v359_v43  ;;  %v372_v21 = vld [vmem:[%s1409_s6 + $0x68] sm:$0xff]  ;;  %v684_v44 = vld [vmem:[%s1410_s7] ss:$0 sm:$0xff]  ;;  %s1002_s7 = smov [#allocation2]  }
  0x26   :  { %940 = vmatprep.subr.bf16.mxu0 %v996_v7  ;;  %v931_v24 = vpack.c.bf16 %v372_v21, %v371_v20 }
  0x29   :  { %942 = vmatpush3.bf16.msra.mxu0 %v941_v27  ;;  %v374_v27 = vld [vmem:[%s1409_s6 + $0x78] sm:$0xff] }
  0x2a   :  { %943 = vmatprep.subr.bf16.mxu0 %v996_v7  ;;  %v935_v28 = vpack.c.bf16 %v374_v27, %v373_v26 }
  0x2d   :  { %946 = vmatpush3.bf16.msk.msra.mxu0 %vm1155_vm3, %v944_v32  ;;  %v400_v32 = vld [vmem:[%s1411_s8 + $0x10] sm:$0xff] }
  0x2e   :  { %947 = vmatprep.subr.bf16.mxu0 %v996_v7 }
  0x30   :  { %835 = vmatmul.mubr.msk.f32.vlgmr.msra.gmra.mrb[2].mxu0 %vm109_vm4, %v358_v33  ;;  %v401_v33 = vld [vmem:[%s1411_s8 + $0x18] sm:$0xff] }
  0x31   :  { %851 = vmatprep.mubr.msk.f32.mxu0 %vm998_vm0, %v999_v18  ;;  %949 = vmatpush3.bf16.msra.mxu0 %v948_v31 }
  0x32   :  { %950 = vmatprep.subr.bf16.mxu0 %v996_v7 }
  0xe9   :  { %v252_v34 = vpop.f32.mrb[0].mxu1 }
  0xea   :  { %v804_v35 = vpop.f32.mrb[1].mxu1 }
  0xeb   :  { %v402_v35 = vld [vmem:[%s1411_s8 + $0x20] sm:$0xff] }
  0xf7   :  { %v722_v37 = vpop.f32.mrb[0].mxu0 }
  0xf8   :  { %v723_v38 = vpop.f32.mrb[1].mxu0 }
  0xf9   :  { %v724_v40 = vadd.f32 %v723_v38, %v722_v37  ;;  %v954_v37 = vpack.c.bf16 %v403_v36, %v402_v35 }
  0xfb   :  { %v183_v42 = vadd.f32 %v724_v40, %v678_v39  ;;  %v404_v40 = vld [vmem:[%s1411_s8 + $0x30] sm:$0x3] }
  0xfd   :  { %v253_v47 = vadd.f32 %v252_v34, %v183_v42  ;;  %v951_v34 = vpack.c.bf16 %v401_v33, %v400_v32 }
  0xff   :  { %v256_v50 = vmax.f32 %v253_v47, 0.0  ;;  %952 = vmatpush3.bf16.msra.mxu0 %v951_v34 }
 0x100   :  { %953 = vmatprep.subr.bf16.mxu0 %v996_v7 }
 0x101   :  { %820 = vmatmul.mubr.msk.f32.vlgmr.msra.gmra.mrb[2].mxu1 %vm263_vm6, %v256_v50 }
 0x102   :  { %908 = vmatpush3.bf16.msra.mxu1 %v907_v48  ;;  %485 = vmatprep.mubr.f32.mxu1 %v414_v49  ;;  %v681_v49 = vld [vmem:[%s1408_s5] ss:$0 sm:$0xff]  ;;  %s1001_s5 = smov 10  }
 0x103   :  { %910 = vmatprep.subr.bf16.mxu1 %v909_v51  ;;  %v557_v38 = vpop.f32.mrb[2].mxu0  ;;  %955 = vmatpush3.bf16.msra.mxu0 %v954_v37 }
 0x104   :  { %v836_v39 = vpop.f32.mrb[3].mxu0  ;;  %849 = vmatprep.subr.mxu0 %v999_v18  ;;  %v687_v18 = vld [vmem:[%s1412_s9] ss:$0 sm:$0xff]  ;;  %s670_s9 = sshll.u32 %s1002_s7, 4  ;;  %s671_s9 = int_to_ptr.vmem [resolvable:$true] %s670_s9 }
 0x105   :  { %s972_s21 = scalar_lea.vmem %s671_s9, 32  ;;  %p977_p1 = scmp.lt.s32.totalorder %s671_s9, %s671_s9 }
 0x106   :  { %912 = vmatpush3.bf16.msra.mxu1 %v911_v56  ;;  %p973_p0 = scmp.ne.s32.totalorder %s671_s9, %s972_s21  ;;  %p978_p2 = scmp.lt.s32.totalorder %s972_s21, %s972_s21 }
 0x107   :  { %914 = vmatprep.subr.bf16.mxu1 %v913_v57  ;;  %850 = vmatpush3.msk.msra.mxu0 %vm267_vm5, %v404_v40 }
 0x108   :  { %p979_p3 = por %p978_p2, %p977_p1 }
 0x10a   :  { %916 = vmatpush3.bf16.msra.mxu1 %v915_v62  ;;  %p980_p4 = pnand %p979_p3, %p973_p0 }
 0x10b   :  { %918 = vmatprep.subr.bf16.mxu1 %v917_v63 }
 0x10e   :  { %920 = vmatpush3.bf16.msra.mxu1 %v919_v4 }
 0x10f   :  { %922 = vmatprep.subr.bf16.mxu1 %v921_v5 }
 0x112   :  { %924 = vmatpush3.bf16.msra.mxu1 %v923_v11 }
 0x113   :  { %926 = vmatprep.subr.bf16.mxu1 %v925_v12 }
 0x116   :  { %928 = vmatpush3.bf16.msra.mxu1 %v927_v17 }
 0x117   :  { %930 = vmatprep.subr.bf16.mxu1 %v929_v19 }
 0x11a   :  { %932 = vmatpush3.bf16.msra.mxu1 %v931_v24 }
 0x11b   :  { %934 = vmatprep.subr.bf16.mxu1 %v933_v25 }
 0x11e   :  { %936 = vmatpush3.bf16.msra.mxu1 %v935_v28 }
 0x121   :  { %486 = vmatmul.mubr.f32.vlgmr.msra.gmra.mrb[4].mxu1 %v1256_v41 }
 0x1d4   :  { %v337_v7 = vpop.f32.mrb[2].mxu1 }
 0x1d5   :  { %v821_v41 = vpop.f32.mrb[3].mxu1  ;;  %v338_v53 = vadd.f32 %v681_v49, %v337_v7 }
 0x1d7   :  { %v342_v55 = vsel %vm341_vm7, %v338_v53, -inf }
 0x1f4   :  { %v772_v42 = vpop.f32.mrb[4].mxu1 }
 0x1f5   :  { %v773_v43 = vpop.f32.mrb[5].mxu1 }
 0x1f6   :  { %v774_v45 = vadd.f32 %v773_v43, %v772_v42 }
 0x1f8   :  { %v488_v46 = vadd.f32 %v774_v45, %v684_v44 }
 0x1fa   :  { %v558_v47 = vadd.f32 %v557_v38, %v488_v46 }
 0x1fc   :  { %v561_v48 = vmax.f32 %v558_v47, 0.0 }
 0x1fe   :  { %852 = vmatmul.mubr.msk.f32.vlgmr.msra.gmra.mrb[4].mxu0 %vm263_vm6, %v561_v48 }
 0x2d1   :  { %v640_v50 = vpop.f32.mrb[4].mxu0 }
 0x2d2   :  { %v641_v51 = vadd.f32 %v687_v18, %v640_v50  ;;  %v853_v52 = vpop.f32.mrb[5].mxu0 }
 0x2d4   :  { %v644_v54 = vsel %vm341_vm7, %v641_v51, -inf }
 0x2d5   :  { %645 = vmax.xlane.f32.xlu0 %v644_v54 }
 0x2d9   :  { %343 = vmax.xlane.f32.xlu0 %v342_v55 }
 0x362   :  { %v646_v56 = vpop.xlane.xlu0 %645 }
 0x363   :  { %v647_v57 = vsub.f32 %v641_v51, %v646_v56 }
 0x365   :  { %v648_v58 = vmul.f32 1.442695, %v647_v57 }
 0x366   :  { %v344_v59 = vpop.xlane.xlu0 %343 }
 0x367   :  { %964 = vpow2.f32 %v648_v58  ;;  %v345_v60 = vsub.f32 %v338_v53, %v344_v59 }
 0x369   :  { %v346_v61 = vmul.f32 1.442695, %v345_v60 }
 0x36b   :  { %966 = vpow2.f32 %v346_v61 }
 0x371   :  { %v965_v62 = vpop.eup %964 }
 0x372   :  { %v650_v63 = vsel %vm341_vm7, %v965_v62, 0.0 }
 0x373   :  { %651 = vadd.xlane.f32.xlu1 %v650_v63 }
 0x375   :  { %v967_v0 = vpop.eup %966 }
 0x376   :  { %v348_v1 = vsel %vm341_vm7, %v967_v0, 0.0 }
 0x377   :  { %349 = vadd.xlane.f32.xlu1 %v348_v1 }
 0x400   :  { %v652_v2 = vpop.xlane.xlu1 %651 }
 0x401   :  { %968 = vlog2.f32 %v652_v2 }
 0x404   :  { %v350_v6 = vpop.xlane.xlu1 %349 }
 0x405   :  { %970 = vlog2.f32 %v350_v6 }
 0x40b   :  { %v969_v3 = vpop.eup %968 }
 0x40c   :  { %v654_v4 = vmul.f32 0.6931472, %v969_v3 }
 0x40e   :  { %v655_v5 = vsub.f32 %v647_v57, %v654_v4 }
 0x40f   :  { %v971_v8 = vpop.eup %970 }
 0x410   :  { %657 = vrot.lane.b32.xlu0 %v655_v5, %s1001_s5  ;;  %v352_v9 = vmul.f32 0.6931472, %v971_v8 }
 0x412   :  { %v353_v10 = vsub.f32 %v345_v60, %v352_v9 }
 0x482   :  { %v658_v11 = vpop.permute.xlu0 %657 }
 0x483   :  { %v661_v12 = vsel %vm660_vm8, %v353_v10, %v658_v11 }
 0x484   :  { %663 = vst.msk [vmem:[#allocation2] sm:$0x3] %vm662_vm9, %v661_v12 }
 0x485   :  { %983 = shalt.err (!%p980_p4)
}
 0x486   :  { %s984_s24 = scalar_lea.hbm %s1413_s10, 32 }
 0x487   :  { %p985_p5 = scmp.ne.s32.totalorder %s1413_s10, %s984_s24  ;;  %p988_p6 = scmp.lt.u32.totalorder %s984_s24, %s1413_s10 }
 0x489   :  { %p990_p7 = pnand %p988_p6, %p985_p5 }
 0x48b   :  { %993 = shalt.err (!%p990_p7)
}
 0x48c   :  { %673 = dma.vmem_to_hbm [thread:$0]  %s671_s9, 32, %s1413_s10, [#allocation3]  }
 0x48d   :  { %994 = dma.done.wait [#allocation3], 32  }
 0x48e   :  { %995 = vsyncadd [#allocation3], 4294967264 }
 0x48f   :  { %677 = vsyncpa [#allocation3], 1 }

</bundles_post_ra>
